<compile_context>
chip_gen: v7x
topology: tpu7x:2x2x1
jax: 0.10.0
libtpu: 0.0.40
codegen_flags: <defaults>
</compile_context>

<pallas_src>
import jax
import jax.numpy as jnp
from jax import lax
from jax.experimental import pallas as pl
from jax.experimental.pallas import tpu as pltpu

LANES = 128
SUB = 8
CHUNK = SUB * LANES        # 1024 elements = one (8, 128) f32 vreg tile
TILE_CHUNKS = 256          # 256 chunks = 2048 rows = 1 MiB per input block
SMOOTH = 1e-7


def _cdiv(a, b):
    return (a + b - 1) // b


def _num_tensorcores():
    """Best-effort TensorCores-per-chip: 2 on v7x, 1 on v5e/v6e."""
    try:
        kind = jax.devices()[0].device_kind.lower()
    except Exception:
        return 1
    return 2 if ("v7" in kind or "tpu7" in kind) else 1


def _loss_kernel(p1, p2, p3, y1, y2, y3, out_ref):
    # grid = (core, step); step is the reduction ("arbitrary") axis and the
    # output block index is constant along it, so out_ref stays VMEM-resident
    # and acts as the accumulator directly (no scratch).
    j = pl.program_id(1)

    @pl.when(j == 0)
    def _init():
        out_ref[...] = jnp.zeros_like(out_ref)

    nchunks = p1.shape[0]                      # static block extent

    def body(c, carry):
        l1a, l1b, l1c, nbce, inter, psum = carry
        a = p1[c]                              # (8, 128) — one vreg per operand
        b = y1[c]
        l1a = l1a + jnp.abs(a - b)
        l1b = l1b + jnp.abs(p2[c] - y2[c])
        l1c = l1c + jnp.abs(p3[c] - y3[c])
        # PyTorch BCELoss clamps log terms at -100.  Accumulate the NEGATED
        # BCE integrand: ln(1-a) + b*(ln a - ln(1-a)); wrapper negates once.
        ln_p = jnp.maximum(jnp.log(a), -100.0)
        ln_1mp = jnp.maximum(jnp.log(1.0 - a), -100.0)
        nbce = nbce + (ln_1mp + b * (ln_p - ln_1mp))
        inter = inter + a * b                  # dice intersection
        psum = psum + (a + b)                  # sum(pred1) + sum(y1) fused
        return (l1a, l1b, l1c, nbce, inter, psum)

    zeros = jnp.zeros((SUB, LANES), jnp.float32)
    acc = lax.fori_loop(0, nchunks, body, (zeros,) * 6,
                        unroll=min(8, nchunks))

    for i in range(6):                         # one small RMW per step
        out_ref[0, i] += acc[i]


def _partial_sums_jax(p1, p2, p3, y1, y2, y3):
    """Same six partial sums (BCE slot negated) for the tiny un-tiled tail."""
    a, b = p1, y1
    ln_p = jnp.maximum(jnp.log(a), -100.0)
    ln_1mp = jnp.maximum(jnp.log(1.0 - a), -100.0)
    return jnp.stack([
        jnp.sum(jnp.abs(a - b)),
        jnp.sum(jnp.abs(p2 - y2)),
        jnp.sum(jnp.abs(p3 - y3)),
        jnp.sum(ln_1mp + b * (ln_p - ln_1mp)),
        jnp.sum(a * b),
        jnp.sum(a + b),
    ]).astype(jnp.float32)


def _bulk_partial_sums(flats, num_cores):
    """Run the Pallas kernel over the 1024-aligned bulk; returns ((6,), kernel_n)."""
    n = flats[0].shape[0]
    bulk_chunks = n // CHUNK                   # caller guarantees > 0
    if bulk_chunks < num_cores:
        num_cores = 1

    steps = _cdiv(bulk_chunks, num_cores * TILE_CHUNKS)
    blk_chunks = bulk_chunks // (num_cores * steps)   # <= TILE_CHUNKS, >= 1
    kernel_chunks = num_cores * steps * blk_chunks
    kernel_n = kernel_chunks * CHUNK

    def view3d(x):
        # Free bitcast when kernel_n == n (the aligned / test case); only the
        # rare unaligned case pays a prefix-slice copy (still cheaper than the
        # old full jnp.pad write + re-read).
        if kernel_n != n:
            x = x[:kernel_n]
        return x.reshape(kernel_chunks, SUB, LANES)

    args = tuple(view3d(x) for x in flats)

    in_spec = pl.BlockSpec((blk_chunks, SUB, LANES),
                           lambda c, j: (c * steps + j, 0, 0))
    out_spec = pl.BlockSpec((1, 6, SUB, LANES),
                            lambda c, j: (c, 0, 0, 0))

    if num_cores > 1:
        dim_sem = (pltpu.CORE_PARALLEL, pltpu.ARBITRARY)   # real 2-TC split (v7x)
    else:
        dim_sem = ("arbitrary", "arbitrary")

    partials = pl.pallas_call(
        _loss_kernel,
        out_shape=jax.ShapeDtypeStruct((num_cores, 6, SUB, LANES), jnp.float32),
        grid_spec=pltpu.PrefetchScalarGridSpec(
            num_scalar_prefetch=0,
            grid=(num_cores, steps),
            in_specs=[in_spec] * 6,
            out_specs=out_spec,
        ),
        compiler_params=pltpu.CompilerParams(
            dimension_semantics=dim_sem,
            vmem_limit_bytes=32 * 1024 * 1024,
        ),
    )(*args)

    return jnp.sum(partials, axis=(0, 2, 3)), kernel_n


def pallas_loss(pred1, pred2, pred3, y1, y2, y3):
    """Equivalent of Loss.forward: mean-L1 x3 + 0.5*(BCE + (1 - Dice)) on pair 1."""
    n = pred1.size
    assert all(t.size == n for t in (pred2, pred3, y1, y2, y3)), \
        "all tensors assumed same size"

    flats = [jnp.ravel(t).astype(jnp.float32)
             for t in (pred1, pred2, pred3, y1, y2, y3)]

    sums = jnp.zeros((6,), jnp.float32)
    kernel_n = 0
    if n >= CHUNK:
        num_cores = _num_tensorcores()
        try:
            bulk_sums, kernel_n = _bulk_partial_sums(flats, num_cores)
        except Exception:
            if num_cores == 1:
                raise
            # Multi-core split unsupported on this chip/runtime: fall back.
            bulk_sums, kernel_n = _bulk_partial_sums(flats, 1)
        sums = sums + bulk_sums

    if kernel_n < n:                           # < 1 block of leftover + element tail
        sums = sums + _partial_sums_jax(*(x[kernel_n:] for x in flats))

    nf = jnp.float32(n)
    l1_mean = (sums[0] + sums[1] + sums[2]) / (3.0 * nf)
    bce = -sums[3] / nf                        # undo the in-kernel negation once
    dice = (2.0 * sums[4] + SMOOTH) / (sums[5] + SMOOTH)
    return l1_mean + 0.5 * (bce + (1.0 - dice))


def _reference_loss(pred1, pred2, pred3, y1, y2, y3):
    def l1(p, y):
        return jnp.mean(jnp.abs(p - y))

    bce = jnp.mean(-(y1 * jnp.maximum(jnp.log(pred1), -100.0)
                     + (1.0 - y1) * jnp.maximum(jnp.log(1.0 - pred1), -100.0)))
    pf, yf = pred1.reshape(-1), y1.reshape(-1)
    inter = jnp.sum(pf * yf)
    dice = (2.0 * inter + SMOOTH) / (jnp.sum(pf) + jnp.sum(yf) + SMOOTH)
    return (l1(pred1, y1) + l1(pred2, y2) + l1(pred3, y3)) / 3.0 \
        + 0.5 * (bce + (1.0 - dice))


if __name__ == "__main__":
    key = jax.random.PRNGKey(0)
    ks = jax.random.split(key, 6)
    shape = (2, 4, 16, 16)  # NCHW, 2048 elements

    # preds in (0,1) (BCELoss requires probabilities); targets in [0,1]
    pred1 = jax.nn.sigmoid(jax.random.normal(ks[0], shape, jnp.float32))
    pred2 = jax.nn.sigmoid(jax.random.normal(ks[1], shape, jnp.float32))
    pred3 = jax.nn.sigmoid(jax.random.normal(ks[2], shape, jnp.float32))
    y1 = (jax.random.uniform(ks[3], shape) > 0.5).astype(jnp.float32)
    y2 = jax.random.uniform(ks[4], shape, jnp.float32)
    y3 = jax.random.uniform(ks[5], shape, jnp.float32)

    loss = pallas_loss(pred1, pred2, pred3, y1, y2, y3)
    jax.block_until_ready(loss)

    ref = _reference_loss(pred1, pred2, pred3, y1, y2, y3)
    assert jnp.allclose(loss, ref, rtol=1e-5, atol=1e-5), (loss, ref)
    print("KERNEL_OK")
</pallas_src>

<mosaic_0001>
module attributes {stable_mosaic.version = 11 : i64} {
  func.func @_loss_kernel(%arg0: i32, %arg1: i32, %arg2: memref<2x8x128xf32, #tpu.memory_space<vmem>>, %arg3: memref<2x8x128xf32, #tpu.memory_space<vmem>>, %arg4: memref<2x8x128xf32, #tpu.memory_space<vmem>>, %arg5: memref<2x8x128xf32, #tpu.memory_space<vmem>>, %arg6: memref<2x8x128xf32, #tpu.memory_space<vmem>>, %arg7: memref<2x8x128xf32, #tpu.memory_space<vmem>>, %arg8: memref<1x6x8x128xf32, #tpu.memory_space<vmem>>) attributes {dimension_semantics = [#tpu.dimension_semantics<arbitrary>, #tpu.dimension_semantics<arbitrary>], iteration_bounds = array<i64: 1, 1>, scalar_prefetch = 0 : i64, scratch_operands = 0 : i64, tpu.core_type = #tpu.core_type<tc>, window_params = [{transform_indices = @transform_0, window_bounds = array<i64: 2, 8, 128>}, {transform_indices = @transform_1, window_bounds = array<i64: 2, 8, 128>}, {transform_indices = @transform_2, window_bounds = array<i64: 2, 8, 128>}, {transform_indices = @transform_3, window_bounds = array<i64: 2, 8, 128>}, {transform_indices = @transform_4, window_bounds = array<i64: 2, 8, 128>}, {transform_indices = @transform_5, window_bounds = array<i64: 2, 8, 128>}, {transform_indices = @transform_6, window_bounds = array<i64: 1, 6, 8, 128>}]} {
    %c0_i32 = arith.constant 0 : i32
    %0 = arith.cmpi eq, %arg1, %c0_i32 : i32
    %1 = arith.extui %0 : i1 to i32
    %c0_i32_0 = arith.constant 0 : i32
    %2 = arith.cmpi ne, %1, %c0_i32_0 : i32
    scf.if %2 {
      %cst_74 = arith.constant 0.000000e+00 : f32
      %126 = vector.broadcast %cst_74 : f32 to vector<1x6x8x128xf32>
      %c0_75 = arith.constant 0 : index
      %c0_76 = arith.constant 0 : index
      %c0_77 = arith.constant 0 : index
      %c0_78 = arith.constant 0 : index
      %127 = vector.load %arg8[%c0_75, %c0_76, %c0_77, %c0_78] : memref<1x6x8x128xf32, #tpu.memory_space<vmem>>, vector<1x6x8x128xf32>
      tpu.vector_store %arg8[%c0_75, %c0_76, %c0_77, %c0_78], %126 {strides = array<i32>} : memref<1x6x8x128xf32, #tpu.memory_space<vmem>>, vector<1x6x8x128xf32>,
    } else {
    }
    %cst = arith.constant 0.000000e+00 : f32
    %3 = vector.broadcast %cst : f32 to vector<8x128xf32>
    %c0_i32_1 = arith.constant 0 : i32
    %4 = arith.index_cast %c0_i32_1 : i32 to index
    %c0 = arith.constant 0 : index
    %c0_2 = arith.constant 0 : index
    %5 = vector.load %arg2[%4, %c0, %c0_2] : memref<2x8x128xf32, #tpu.memory_space<vmem>>, vector<1x8x128xf32>
    %6 = vector.shape_cast %5 : vector<1x8x128xf32> to vector<8x128xf32>
    %7 = arith.index_cast %c0_i32_1 : i32 to index
    %c0_3 = arith.constant 0 : index
    %c0_4 = arith.constant 0 : index
    %8 = vector.load %arg5[%7, %c0_3, %c0_4] : memref<2x8x128xf32, #tpu.memory_space<vmem>>, vector<1x8x128xf32>
    %9 = vector.shape_cast %8 : vector<1x8x128xf32> to vector<8x128xf32>
    %10 = arith.subf %6, %9 : vector<8x128xf32>
    %11 = math.absf %10 : vector<8x128xf32>
    %12 = arith.addf %3, %11 : vector<8x128xf32>
    %13 = arith.index_cast %c0_i32_1 : i32 to index
    %c0_5 = arith.constant 0 : index
    %c0_6 = arith.constant 0 : index
    %14 = vector.load %arg3[%13, %c0_5, %c0_6] : memref<2x8x128xf32, #tpu.memory_space<vmem>>, vector<1x8x128xf32>
    %15 = vector.shape_cast %14 : vector<1x8x128xf32> to vector<8x128xf32>
    %16 = arith.index_cast %c0_i32_1 : i32 to index
    %c0_7 = arith.constant 0 : index
    %c0_8 = arith.constant 0 : index
    %17 = vector.load %arg6[%16, %c0_7, %c0_8] : memref<2x8x128xf32, #tpu.memory_space<vmem>>, vector<1x8x128xf32>
    %18 = vector.shape_cast %17 : vector<1x8x128xf32> to vector<8x128xf32>
    %19 = arith.subf %15, %18 : vector<8x128xf32>
    %20 = math.absf %19 : vector<8x128xf32>
    %21 = arith.addf %3, %20 : vector<8x128xf32>
    %22 = arith.index_cast %c0_i32_1 : i32 to index
    %c0_9 = arith.constant 0 : index
    %c0_10 = arith.constant 0 : index
    %23 = vector.load %arg4[%22, %c0_9, %c0_10] : memref<2x8x128xf32, #tpu.memory_space<vmem>>, vector<1x8x128xf32>
    %24 = vector.shape_cast %23 : vector<1x8x128xf32> to vector<8x128xf32>
    %25 = arith.index_cast %c0_i32_1 : i32 to index
    %c0_11 = arith.constant 0 : index
    %c0_12 = arith.constant 0 : index
    %26 = vector.load %arg7[%25, %c0_11, %c0_12] : memref<2x8x128xf32, #tpu.memory_space<vmem>>, vector<1x8x128xf32>
    %27 = vector.shape_cast %26 : vector<1x8x128xf32> to vector<8x128xf32>
    %28 = arith.subf %24, %27 : vector<8x128xf32>
    %29 = math.absf %28 : vector<8x128xf32>
    %30 = arith.addf %3, %29 : vector<8x128xf32>
    %31 = math.log %6 : vector<8x128xf32>
    %cst_13 = arith.constant -1.000000e+02 : f32
    %32 = vector.broadcast %cst_13 : f32 to vector<8x128xf32>
    %33 = arith.maximumf %31, %32 : vector<8x128xf32>
    %cst_14 = arith.constant 1.000000e+00 : f32
    %34 = vector.broadcast %cst_14 : f32 to vector<8x128xf32>
    %35 = arith.subf %34, %6 : vector<8x128xf32>
    %36 = math.log %35 : vector<8x128xf32>
    %cst_15 = arith.constant -1.000000e+02 : f32
    %37 = vector.broadcast %cst_15 : f32 to vector<8x128xf32>
    %38 = arith.maximumf %36, %37 : vector<8x128xf32>
    %39 = arith.subf %33, %38 : vector<8x128xf32>
    %40 = arith.mulf %9, %39 : vector<8x128xf32>
    %41 = arith.addf %38, %40 : vector<8x128xf32>
    %42 = arith.addf %3, %41 : vector<8x128xf32>
    %43 = arith.mulf %6, %9 : vector<8x128xf32>
    %44 = arith.addf %3, %43 : vector<8x128xf32>
    %45 = arith.addf %6, %9 : vector<8x128xf32>
    %46 = arith.addf %3, %45 : vector<8x128xf32>
    %c1_i32 = arith.constant 1 : i32
    %47 = arith.index_cast %c1_i32 : i32 to index
    %c0_16 = arith.constant 0 : index
    %c0_17 = arith.constant 0 : index
    %48 = vector.load %arg2[%47, %c0_16, %c0_17] : memref<2x8x128xf32, #tpu.memory_space<vmem>>, vector<1x8x128xf32>
    %49 = vector.shape_cast %48 : vector<1x8x128xf32> to vector<8x128xf32>
    %50 = arith.index_cast %c1_i32 : i32 to index
    %c0_18 = arith.constant 0 : index
    %c0_19 = arith.constant 0 : index
    %51 = vector.load %arg5[%50, %c0_18, %c0_19] : memref<2x8x128xf32, #tpu.memory_space<vmem>>, vector<1x8x128xf32>
    %52 = vector.shape_cast %51 : vector<1x8x128xf32> to vector<8x128xf32>
    %53 = arith.subf %49, %52 : vector<8x128xf32>
    %54 = math.absf %53 : vector<8x128xf32>
    %55 = arith.addf %12, %54 : vector<8x128xf32>
    %56 = arith.index_cast %c1_i32 : i32 to index
    %c0_20 = arith.constant 0 : index
    %c0_21 = arith.constant 0 : index
    %57 = vector.load %arg3[%56, %c0_20, %c0_21] : memref<2x8x128xf32, #tpu.memory_space<vmem>>, vector<1x8x128xf32>
    %58 = vector.shape_cast %57 : vector<1x8x128xf32> to vector<8x128xf32>
    %59 = arith.index_cast %c1_i32 : i32 to index
    %c0_22 = arith.constant 0 : index
    %c0_23 = arith.constant 0 : index
    %60 = vector.load %arg6[%59, %c0_22, %c0_23] : memref<2x8x128xf32, #tpu.memory_space<vmem>>, vector<1x8x128xf32>
    %61 = vector.shape_cast %60 : vector<1x8x128xf32> to vector<8x128xf32>
    %62 = arith.subf %58, %61 : vector<8x128xf32>
    %63 = math.absf %62 : vector<8x128xf32>
    %64 = arith.addf %21, %63 : vector<8x128xf32>
    %65 = arith.index_cast %c1_i32 : i32 to index
    %c0_24 = arith.constant 0 : index
    %c0_25 = arith.constant 0 : index
    %66 = vector.load %arg4[%65, %c0_24, %c0_25] : memref<2x8x128xf32, #tpu.memory_space<vmem>>, vector<1x8x128xf32>
    %67 = vector.shape_cast %66 : vector<1x8x128xf32> to vector<8x128xf32>
    %68 = arith.index_cast %c1_i32 : i32 to index
    %c0_26 = arith.constant 0 : index
    %c0_27 = arith.constant 0 : index
    %69 = vector.load %arg7[%68, %c0_26, %c0_27] : memref<2x8x128xf32, #tpu.memory_space<vmem>>, vector<1x8x128xf32>
    %70 = vector.shape_cast %69 : vector<1x8x128xf32> to vector<8x128xf32>
    %71 = arith.subf %67, %70 : vector<8x128xf32>
    %72 = math.absf %71 : vector<8x128xf32>
    %73 = arith.addf %30, %72 : vector<8x128xf32>
    %74 = math.log %49 : vector<8x128xf32>
    %cst_28 = arith.constant -1.000000e+02 : f32
    %75 = vector.broadcast %cst_28 : f32 to vector<8x128xf32>
    %76 = arith.maximumf %74, %75 : vector<8x128xf32>
    %cst_29 = arith.constant 1.000000e+00 : f32
    %77 = vector.broadcast %cst_29 : f32 to vector<8x128xf32>
    %78 = arith.subf %77, %49 : vector<8x128xf32>
    %79 = math.log %78 : vector<8x128xf32>
    %cst_30 = arith.constant -1.000000e+02 : f32
    %80 = vector.broadcast %cst_30 : f32 to vector<8x128xf32>
    %81 = arith.maximumf %79, %80 : vector<8x128xf32>
    %82 = arith.subf %76, %81 : vector<8x128xf32>
    %83 = arith.mulf %52, %82 : vector<8x128xf32>
    %84 = arith.addf %81, %83 : vector<8x128xf32>
    %85 = arith.addf %42, %84 : vector<8x128xf32>
    %86 = arith.mulf %49, %52 : vector<8x128xf32>
    %87 = arith.addf %44, %86 : vector<8x128xf32>
    %88 = arith.addf %49, %52 : vector<8x128xf32>
    %89 = arith.addf %46, %88 : vector<8x128xf32>
    %c2_i32 = arith.constant 2 : i32
    %c0_31 = arith.constant 0 : index
    %c0_32 = arith.constant 0 : index
    %c0_33 = arith.constant 0 : index
    %c0_34 = arith.constant 0 : index
    %90 = vector.load %arg8[%c0_31, %c0_32, %c0_33, %c0_34] : memref<1x6x8x128xf32, #tpu.memory_space<vmem>>, vector<1x1x8x128xf32>
    %91 = vector.shape_cast %90 : vector<1x1x8x128xf32> to vector<8x128xf32>
    %92 = arith.addf %91, %55 : vector<8x128xf32>
    %c0_35 = arith.constant 0 : index
    %c0_36 = arith.constant 0 : index
    %c0_37 = arith.constant 0 : index
    %c0_38 = arith.constant 0 : index
    %93 = vector.load %arg8[%c0_35, %c0_36, %c0_37, %c0_38] : memref<1x6x8x128xf32, #tpu.memory_space<vmem>>, vector<1x1x8x128xf32>
    %94 = vector.shape_cast %93 : vector<1x1x8x128xf32> to vector<8x128xf32>
    %95 = vector.shape_cast %92 : vector<8x128xf32> to vector<1x1x8x128xf32>
    tpu.vector_store %arg8[%c0_35, %c0_36, %c0_37, %c0_38], %95 {strides = array<i32>} : memref<1x6x8x128xf32, #tpu.memory_space<vmem>>, vector<1x1x8x128xf32>,
    %c0_39 = arith.constant 0 : index
    %c1 = arith.constant 1 : index
    %c0_40 = arith.constant 0 : index
    %c0_41 = arith.constant 0 : index
    %96 = vector.load %arg8[%c0_39, %c1, %c0_40, %c0_41] : memref<1x6x8x128xf32, #tpu.memory_space<vmem>>, vector<1x1x8x128xf32>
    %97 = vector.shape_cast %96 : vector<1x1x8x128xf32> to vector<8x128xf32>
    %98 = arith.addf %97, %64 : vector<8x128xf32>
    %c0_42 = arith.constant 0 : index
    %c1_43 = arith.constant 1 : index
    %c0_44 = arith.constant 0 : index
    %c0_45 = arith.constant 0 : index
    %99 = vector.load %arg8[%c0_42, %c1_43, %c0_44, %c0_45] : memref<1x6x8x128xf32, #tpu.memory_space<vmem>>, vector<1x1x8x128xf32>
    %100 = vector.shape_cast %99 : vector<1x1x8x128xf32> to vector<8x128xf32>
    %101 = vector.shape_cast %98 : vector<8x128xf32> to vector<1x1x8x128xf32>
    tpu.vector_store %arg8[%c0_42, %c1_43, %c0_44, %c0_45], %101 {strides = array<i32>} : memref<1x6x8x128xf32, #tpu.memory_space<vmem>>, vector<1x1x8x128xf32>,
    %c0_46 = arith.constant 0 : index
    %c2 = arith.constant 2 : index
    %c0_47 = arith.constant 0 : index
    %c0_48 = arith.constant 0 : index
    %102 = vector.load %arg8[%c0_46, %c2, %c0_47, %c0_48] : memref<1x6x8x128xf32, #tpu.memory_space<vmem>>, vector<1x1x8x128xf32>
    %103 = vector.shape_cast %102 : vector<1x1x8x128xf32> to vector<8x128xf32>
    %104 = arith.addf %103, %73 : vector<8x128xf32>
    %c0_49 = arith.constant 0 : index
    %c2_50 = arith.constant 2 : index
    %c0_51 = arith.constant 0 : index
    %c0_52 = arith.constant 0 : index
    %105 = vector.load %arg8[%c0_49, %c2_50, %c0_51, %c0_52] : memref<1x6x8x128xf32, #tpu.memory_space<vmem>>, vector<1x1x8x128xf32>
    %106 = vector.shape_cast %105 : vector<1x1x8x128xf32> to vector<8x128xf32>
    %107 = vector.shape_cast %104 : vector<8x128xf32> to vector<1x1x8x128xf32>
    tpu.vector_store %arg8[%c0_49, %c2_50, %c0_51, %c0_52], %107 {strides = array<i32>} : memref<1x6x8x128xf32, #tpu.memory_space<vmem>>, vector<1x1x8x128xf32>,
    %c0_53 = arith.constant 0 : index
    %c3 = arith.constant 3 : index
    %c0_54 = arith.constant 0 : index
    %c0_55 = arith.constant 0 : index
    %108 = vector.load %arg8[%c0_53, %c3, %c0_54, %c0_55] : memref<1x6x8x128xf32, #tpu.memory_space<vmem>>, vector<1x1x8x128xf32>
    %109 = vector.shape_cast %108 : vector<1x1x8x128xf32> to vector<8x128xf32>
    %110 = arith.addf %109, %85 : vector<8x128xf32>
    %c0_56 = arith.constant 0 : index
    %c3_57 = arith.constant 3 : index
    %c0_58 = arith.constant 0 : index
    %c0_59 = arith.constant 0 : index
    %111 = vector.load %arg8[%c0_56, %c3_57, %c0_58, %c0_59] : memref<1x6x8x128xf32, #tpu.memory_space<vmem>>, vector<1x1x8x128xf32>
    %112 = vector.shape_cast %111 : vector<1x1x8x128xf32> to vector<8x128xf32>
    %113 = vector.shape_cast %110 : vector<8x128xf32> to vector<1x1x8x128xf32>
    tpu.vector_store %arg8[%c0_56, %c3_57, %c0_58, %c0_59], %113 {strides = array<i32>} : memref<1x6x8x128xf32, #tpu.memory_space<vmem>>, vector<1x1x8x128xf32>,
    %c0_60 = arith.constant 0 : index
    %c4 = arith.constant 4 : index
    %c0_61 = arith.constant 0 : index
    %c0_62 = arith.constant 0 : index
    %114 = vector.load %arg8[%c0_60, %c4, %c0_61, %c0_62] : memref<1x6x8x128xf32, #tpu.memory_space<vmem>>, vector<1x1x8x128xf32>
    %115 = vector.shape_cast %114 : vector<1x1x8x128xf32> to vector<8x128xf32>
    %116 = arith.addf %115, %87 : vector<8x128xf32>
    %c0_63 = arith.constant 0 : index
    %c4_64 = arith.constant 4 : index
    %c0_65 = arith.constant 0 : index
    %c0_66 = arith.constant 0 : index
    %117 = vector.load %arg8[%c0_63, %c4_64, %c0_65, %c0_66] : memref<1x6x8x128xf32, #tpu.memory_space<vmem>>, vector<1x1x8x128xf32>
    %118 = vector.shape_cast %117 : vector<1x1x8x128xf32> to vector<8x128xf32>
    %119 = vector.shape_cast %116 : vector<8x128xf32> to vector<1x1x8x128xf32>
    tpu.vector_store %arg8[%c0_63, %c4_64, %c0_65, %c0_66], %119 {strides = array<i32>} : memref<1x6x8x128xf32, #tpu.memory_space<vmem>>, vector<1x1x8x128xf32>,
    %c0_67 = arith.constant 0 : index
    %c5 = arith.constant 5 : index
    %c0_68 = arith.constant 0 : index
    %c0_69 = arith.constant 0 : index
    %120 = vector.load %arg8[%c0_67, %c5, %c0_68, %c0_69] : memref<1x6x8x128xf32, #tpu.memory_space<vmem>>, vector<1x1x8x128xf32>
    %121 = vector.shape_cast %120 : vector<1x1x8x128xf32> to vector<8x128xf32>
    %122 = arith.addf %121, %89 : vector<8x128xf32>
    %c0_70 = arith.constant 0 : index
    %c5_71 = arith.constant 5 : index
    %c0_72 = arith.constant 0 : index
    %c0_73 = arith.constant 0 : index
    %123 = vector.load %arg8[%c0_70, %c5_71, %c0_72, %c0_73] : memref<1x6x8x128xf32, #tpu.memory_space<vmem>>, vector<1x1x8x128xf32>
    %124 = vector.shape_cast %123 : vector<1x1x8x128xf32> to vector<8x128xf32>
    %125 = vector.shape_cast %122 : vector<8x128xf32> to vector<1x1x8x128xf32>
    tpu.vector_store %arg8[%c0_70, %c5_71, %c0_72, %c0_73], %125 {strides = array<i32>} : memref<1x6x8x128xf32, #tpu.memory_space<vmem>>, vector<1x1x8x128xf32>,
    return
  }
  func.func @transform_0(%arg0: i32, %arg1: i32) -> (i32, i32, i32) {
    %c1_i32 = arith.constant 1 : i32
    %0 = arith.muli %arg0, %c1_i32 : i32
    %1 = arith.addi %0, %arg1 : i32
    %c0_i32 = arith.constant 0 : i32
    %c0_i32_0 = arith.constant 0 : i32
    %c0_i32_1 = arith.constant 0 : i32
    return %1, %c0_i32, %c0_i32_0 : i32, i32, i32
  }
  func.func @transform_1(%arg0: i32, %arg1: i32) -> (i32, i32, i32) {
    %c1_i32 = arith.constant 1 : i32
    %0 = arith.muli %arg0, %c1_i32 : i32
    %1 = arith.addi %0, %arg1 : i32
    %c0_i32 = arith.constant 0 : i32
    %c0_i32_0 = arith.constant 0 : i32
    %c0_i32_1 = arith.constant 0 : i32
    return %1, %c0_i32, %c0_i32_0 : i32, i32, i32
  }
  func.func @transform_2(%arg0: i32, %arg1: i32) -> (i32, i32, i32) {
    %c1_i32 = arith.constant 1 : i32
    %0 = arith.muli %arg0, %c1_i32 : i32
    %1 = arith.addi %0, %arg1 : i32
    %c0_i32 = arith.constant 0 : i32
    %c0_i32_0 = arith.constant 0 : i32
    %c0_i32_1 = arith.constant 0 : i32
    return %1, %c0_i32, %c0_i32_0 : i32, i32, i32
  }
  func.func @transform_3(%arg0: i32, %arg1: i32) -> (i32, i32, i32) {
    %c1_i32 = arith.constant 1 : i32
    %0 = arith.muli %arg0, %c1_i32 : i32
    %1 = arith.addi %0, %arg1 : i32
    %c0_i32 = arith.constant 0 : i32
    %c0_i32_0 = arith.constant 0 : i32
    %c0_i32_1 = arith.constant 0 : i32
    return %1, %c0_i32, %c0_i32_0 : i32, i32, i32
  }
  func.func @transform_4(%arg0: i32, %arg1: i32) -> (i32, i32, i32) {
    %c1_i32 = arith.constant 1 : i32
    %0 = arith.muli %arg0, %c1_i32 : i32
    %1 = arith.addi %0, %arg1 : i32
    %c0_i32 = arith.constant 0 : i32
    %c0_i32_0 = arith.constant 0 : i32
    %c0_i32_1 = arith.constant 0 : i32
    return %1, %c0_i32, %c0_i32_0 : i32, i32, i32
  }
  func.func @transform_5(%arg0: i32, %arg1: i32) -> (i32, i32, i32) {
    %c1_i32 = arith.constant 1 : i32
    %0 = arith.muli %arg0, %c1_i32 : i32
    %1 = arith.addi %0, %arg1 : i32
    %c0_i32 = arith.constant 0 : i32
    %c0_i32_0 = arith.constant 0 : i32
    %c0_i32_1 = arith.constant 0 : i32
    return %1, %c0_i32, %c0_i32_0 : i32, i32, i32
  }
  func.func @transform_6(%arg0: i32, %arg1: i32) -> (i32, i32, i32, i32) {
    %c0_i32 = arith.constant 0 : i32
    %c0_i32_0 = arith.constant 0 : i32
    %c0_i32_1 = arith.constant 0 : i32
    %c0_i32_2 = arith.constant 0 : i32
    return %arg0, %c0_i32, %c0_i32_0, %c0_i32_1 : i32, i32, i32, i32
  }
}

</mosaic_0001>

<bundles_post_ra>
// kernel: tpu_custom_call.1
= control target key start
LH: loop header
LB: loop body
LE: loop exit
PB: predicated region body
PF: predicated region fallthrough
CT: control target
= control target key end

     0   :  { %11 = vsyncpa [#allocation3], 0  ;;  %s579_s0 = inlined_call_operand.hbm [shape: f32[2,8,128], index: 0, kind: input, shape index: {}]   ;;  %s580_s1 = inlined_call_operand.hbm [shape: f32[2,8,128], index: 1, kind: input, shape index: {}]   ;;  %s581_s2 = inlined_call_operand.hbm [shape: f32[2,8,128], index: 2, kind: input, shape index: {}]   ;;  %s582_s3 = inlined_call_operand.hbm [shape: f32[2,8,128], index: 3, kind: input, shape index: {}]   ;;  %s583_s4 = inlined_call_operand.hbm [shape: f32[2,8,128], index: 4, kind: input, shape index: {}]   ;;  %s584_s5 = inlined_call_operand.vmem [shape: f32[2,8,128], index: 5, kind: input, shape index: {}]   ;;  %s585_s6 = inlined_call_operand.hbm [shape: f32[1,6,8,128], index: 6, kind: output, shape index: {}]  }
   0x1   :  { %12 = vsyncpa [#allocation6], 0 }
   0x2   :  { %13 = vsyncpa [#allocation9], 0 }
   0x3   :  { %14 = vsyncpa [#allocation4], 0  ;;  %s426_s21 = smov [#allocation5]   ;;  %s427_s23 = smov [#allocation8]  }
   0x4   :  { %s40_s22 = sshll.u32 %s426_s21, 4  ;;  %s72_s24 = sshll.u32 %s427_s23, 4  ;;  %s41_s22 = int_to_ptr.vmem [resolvable:$true] %s40_s22  ;;  %s469_s24 = int_to_ptr.vmem [resolvable:$true] %s72_s24 }
   0x5   :  { %s286_s27 = scalar_lea.hbm %s580_s1, 256 }
   0x6   :  { %p287_p0 = scmp.ne.s32.totalorder %s580_s1, %s286_s27  ;;  %p290_p1 = scmp.lt.u32.totalorder %s286_s27, %s580_s1 }
   0x8   :  { %p292_p2 = pnand %p290_p1, %p287_p0 }
   0xa   :  { %295 = shalt.err (!%p292_p2)
}
   0xb   :  { %s296_s8 = scalar_lea.vmem %s41_s22, 256  ;;  %p301_p4 = scmp.lt.s32.totalorder %s41_s22, %s41_s22 }
   0xc   :  { %p297_p3 = scmp.ne.s32.totalorder %s41_s22, %s296_s8  ;;  %p302_p5 = scmp.lt.s32.totalorder %s296_s8, %s296_s8 }
   0xe   :  { %p303_p6 = por %p302_p5, %p301_p4 }
  0x10   :  { %p304_p7 = pnand %p303_p6, %p297_p3 }
  0x12   :  { %307 = shalt.err (!%p304_p7)
}
  0x13   :  { %s428_s9 = smov 128   ;;  %s429_s10 = smov 8  }
  0x14   :  { %46 = dma.hbm_to_vmem [thread:$0]  %s580_s1, 256, %s41_s22, [#allocation6], %s428_s9, %s428_s9, %s429_s10  }
  0x15   :  { %s308_s15 = scalar_lea.hbm %s582_s3, 256 }
  0x16   :  { %p309_p8 = scmp.ne.s32.totalorder %s582_s3, %s308_s15  ;;  %p312_p9 = scmp.lt.u32.totalorder %s308_s15, %s582_s3 }
  0x18   :  { %p314_p10 = pnand %p312_p9, %p309_p8 }
  0x1a   :  { %317 = shalt.err (!%p314_p10)
}
  0x1b   :  { %s318_s20 = scalar_lea.vmem %s469_s24, 256  ;;  %p323_p12 = scmp.lt.s32.totalorder %s469_s24, %s469_s24 }
  0x1c   :  { %p319_p11 = scmp.ne.s32.totalorder %s469_s24, %s318_s20  ;;  %p324_p13 = scmp.lt.s32.totalorder %s318_s20, %s318_s20 }
  0x1e   :  { %p325_p0 = por %p324_p13, %p323_p12 }
  0x20   :  { %p326_p1 = pnand %p325_p0, %p319_p11 }
  0x22   :  { %329 = shalt.err (!%p326_p1)
}
  0x23   :  { %78 = dma.hbm_to_vmem [thread:$0]  %s582_s3, 256, %s469_s24, [#allocation9], %s428_s9, %s428_s9, %s429_s10  }
  0x24   :  { %s430_s22 = smov [#allocation2]   ;;  %s431_s25 = smov [#allocation7]  }
  0x25   :  { %s24_s23 = sshll.u32 %s430_s22, 4  ;;  %s56_s26 = sshll.u32 %s431_s25, 4  ;;  %s25_s23 = int_to_ptr.vmem [resolvable:$true] %s24_s23  ;;  %s506_s26 = int_to_ptr.vmem [resolvable:$true] %s56_s26 }
  0x26   :  { %s330_s29 = scalar_lea.hbm %s579_s0, 256 }
  0x27   :  { %p331_p2 = scmp.ne.s32.totalorder %s579_s0, %s330_s29  ;;  %p334_p3 = scmp.lt.u32.totalorder %s330_s29, %s579_s0 }
  0x29   :  { %p336_p4 = pnand %p334_p3, %p331_p2 }
  0x2b   :  { %339 = shalt.err (!%p336_p4)
}
  0x2c   :  { %s340_s3 = scalar_lea.vmem %s25_s23, 256  ;;  %p345_p6 = scmp.lt.s32.totalorder %s25_s23, %s25_s23 }
  0x2d   :  { %p341_p5 = scmp.ne.s32.totalorder %s25_s23, %s340_s3  ;;  %p346_p7 = scmp.lt.s32.totalorder %s340_s3, %s340_s3 }
  0x2f   :  { %p347_p8 = por %p346_p7, %p345_p6 }
  0x31   :  { %p348_p9 = pnand %p347_p8, %p341_p5 }
  0x33   :  { %351 = shalt.err (!%p348_p9)
}
  0x34   :  { %30 = dma.hbm_to_vmem [thread:$0]  %s579_s0, 256, %s25_s23, [#allocation3], %s428_s9, %s428_s9, %s429_s10  }
  0x35   :  { %s352_s15 = scalar_lea.hbm %s581_s2, 256 }
  0x36   :  { %p353_p10 = scmp.ne.s32.totalorder %s581_s2, %s352_s15  ;;  %p356_p11 = scmp.lt.u32.totalorder %s352_s15, %s581_s2 }
  0x38   :  { %p358_p12 = pnand %p356_p11, %p353_p10 }
  0x3a   :  { %361 = shalt.err (!%p358_p12)
}
  0x3b   :  { %s362_s20 = scalar_lea.vmem %s506_s26, 256  ;;  %p367_p0 = scmp.lt.s32.totalorder %s506_s26, %s506_s26 }
  0x3c   :  { %p363_p13 = scmp.ne.s32.totalorder %s506_s26, %s362_s20  ;;  %p368_p1 = scmp.lt.s32.totalorder %s362_s20, %s362_s20 }
  0x3e   :  { %p369_p2 = por %p368_p1, %p367_p0 }
  0x40   :  { %p370_p3 = pnand %p369_p2, %p363_p13 }
  0x42   :  { %373 = shalt.err (!%p370_p3)
}
  0x43   :  { %62 = dma.hbm_to_vmem [thread:$0]  %s581_s2, 256, %s506_s26, [#allocation6], %s428_s9, %s428_s9, %s429_s10  }
  0x44   :  { %s432_s21 = smov [#allocation10]   ;;  %s374_s27 = scalar_lea.hbm %s583_s4, 256 }
  0x45   :  { %s88_s22 = sshll.u32 %s432_s21, 4  ;;  %p375_p4 = scmp.ne.s32.totalorder %s583_s4, %s374_s27  ;;  %s89_s22 = int_to_ptr.vmem [resolvable:$true] %s88_s22 }
  0x46   :  { %p378_p5 = scmp.lt.u32.totalorder %s374_s27, %s583_s4 }
  0x48   :  { %p380_p6 = pnand %p378_p5, %p375_p4 }
  0x4a   :  { %383 = shalt.err (!%p380_p6)
}
  0x4b   :  { %s384_s8 = scalar_lea.vmem %s89_s22, 256  ;;  %p389_p8 = scmp.lt.s32.totalorder %s89_s22, %s89_s22 }
  0x4c   :  { %p385_p7 = scmp.ne.s32.totalorder %s89_s22, %s384_s8  ;;  %p390_p9 = scmp.lt.s32.totalorder %s384_s8, %s384_s8 }
  0x4e   :  { %p391_p10 = por %p390_p9, %p389_p8 }
  0x50   :  { %p392_p11 = pnand %p391_p10, %p385_p7 }
  0x52   :  { %395 = shalt.err (!%p392_p11)
}
  0x53   :  { %94 = dma.hbm_to_vmem [thread:$0]  %s583_s4, 256, %s89_s22, [#allocation9], %s428_s9, %s428_s9, %s429_s10  }
  0x54   :  { %418 = dma.done.wait [#allocation3], 256  }
  0x55   :  { %419 = vsyncadd [#allocation3], 4294967040 }
  0x56   :  { %420 = dma.done.wait [#allocation6], 512  }
  0x57   :  { %421 = vsyncadd [#allocation6], 4294966784 }
  0x58   :  { %422 = dma.done.wait [#allocation9], 512  }
  0x59   :  { %423 = vsyncadd [#allocation9], 4294966784  ;;  %v154_v0 = vld [vmem:[#allocation2] sm:$0xff]  ;;  %v155_v1 = vld [vmem:[#allocation8] sm:$0xff] }
  0x5a   :  { %v185_v2 = vld [vmem:[#allocation2 + $0x8] sm:$0xff]  ;;  %v156_v3 = vsub.f32 %v154_v0, %v155_v1  ;;  %v187_v4 = vld [vmem:[#allocation8 + $0x8] sm:$0xff]  ;;  %v159_v5 = vld [vmem:[#allocation5] sm:$0xff]  ;;  %278 = vlog2.f32 %v154_v0  ;;  %v172_v7 = vsub.f32 1.0, %v154_v0  ;;  %v180_v14 = vmul.f32 %v155_v1, %v154_v0 }
  0x5b   :  { %v160_v6 = vld [vmem:[#allocation10] sm:$0xff]  ;;  %v208_v8 = vsub.f32 1.0, %v185_v2  ;;  %v188_v9 = vsub.f32 %v185_v2, %v187_v4  ;;  %v192_v11 = vld [vmem:[#allocation5 + $0x8] sm:$0xff]  ;;  %v194_v12 = vld [vmem:[#allocation10 + $0x8] sm:$0xff]  ;;  %280 = vlog2.f32 %v185_v2  ;;  %v216_v20 = vmul.f32 %v187_v4, %v185_v2 }
  0x5c   :  { %v161_v10 = vsub.f32 %v159_v5, %v160_v6  ;;  %v164_v13 = vld [vmem:[#allocation7] sm:$0xff]  ;;  %v157_v15 = vand.u32 2147483647, %v156_v3  ;;  %v195_v16 = vsub.f32 %v192_v11, %v194_v12  ;;  %v199_v18 = vld [vmem:[#allocation7 + $0x8] sm:$0xff]  ;;  %282 = vlog2.f32 %v172_v7 }
  0x5d   :  { %v165_v17 = vld [vmem:[%s584_s5] sm:$0xff]  ;;  %v268_v19 = vld [vmem:[%s584_s5 + $0x8] sm:$0xff]  ;;  %v189_v21 = vand.u32 2147483647, %v188_v9  ;;  %284 = vlog2.f32 %v208_v8  ;;  %v217_v26 = vadd.f32 %v216_v20, %v180_v14  ;;  %v182_v27 = vadd.f32 %v155_v1, %v154_v0  ;;  %s433_s5 = smov [#allocation11]  }
  0x5e   :  { %v162_v22 = vand.u32 2147483647, %v161_v10  ;;  %v166_v23 = vsub.f32 %v164_v13, %v165_v17  ;;  %v202_v24 = vsub.f32 %v199_v18, %v268_v19  ;;  %v196_v25 = vand.u32 2147483647, %v195_v16  ;;  %s248_s12 = sshll.u32 %s433_s5, 4  ;;  %s249_s12 = int_to_ptr.vmem [resolvable:$true] %s248_s12 }
  0x5f   :  { %v190_v28 = vadd.f32 %v189_v21, %v157_v15  ;;  %v218_v31 = vadd.f32 %v187_v4, %v185_v2  ;;  %238 = vst [vmem:[#allocation11 + $0x20] sm:$0xff] %v217_v26  ;;  %s396_s13 = scalar_lea.vmem %s249_s12, 768  ;;  %p401_p13 = scmp.lt.s32.totalorder %s249_s12, %s249_s12 }
  0x60   :  { %v167_v29 = vand.u32 2147483647, %v166_v23  ;;  %v203_v30 = vand.u32 2147483647, %v202_v24  ;;  %v197_v32 = vadd.f32 %v196_v25, %v162_v22  ;;  %p397_p12 = scmp.ne.s32.totalorder %s249_s12, %s396_s13  ;;  %p402_p0 = scmp.lt.s32.totalorder %s396_s13, %s396_s13 }
  0x61   :  { %v219_v34 = vadd.f32 %v218_v31, %v182_v27  ;;  %222 = vst [vmem:[#allocation11] sm:$0xff] %v190_v28 }
  0x62   :  { %v204_v33 = vadd.f32 %v203_v30, %v167_v29  ;;  %226 = vst [vmem:[#allocation11 + $0x8] sm:$0xff] %v197_v32  ;;  %p403_p1 = por %p402_p0, %p401_p13 }
  0x63   :  { %242 = vst [vmem:[#allocation11 + $0x28] sm:$0xff] %v219_v34 }
  0x64   :  { %v279_v35 = vpop.eup %278  ;;  %230 = vst [vmem:[#allocation11 + $0x10] sm:$0xff] %v204_v33  ;;  %p404_p2 = pnand %p403_p1, %p397_p12 }
  0x65   :  { %v281_v36 = vpop.eup %280  ;;  %v170_v37 = vmul.f32 0.6931472, %v279_v35 }
  0x66   :  { %v283_v38 = vpop.eup %282  ;;  %v206_v39 = vmul.f32 0.6931472, %v281_v36 }
  0x67   :  { %v171_v40 = vmax.f32 %v170_v37, -100.0  ;;  %v174_v41 = vmul.f32 0.6931472, %v283_v38  ;;  %v285_v42 = vpop.eup %284 }
  0x68   :  { %v207_v44 = vmax.f32 %v206_v39, -100.0  ;;  %v210_v45 = vmul.f32 0.6931472, %v285_v42 }
  0x69   :  { %v175_v43 = vmax.f32 %v174_v41, -100.0 }
  0x6a   :  { %v211_v47 = vmax.f32 %v210_v45, -100.0 }
  0x6b   :  { %v176_v46 = vsub.f32 %v171_v40, %v175_v43 }
  0x6c   :  { %v212_v49 = vsub.f32 %v207_v44, %v211_v47 }
  0x6d   :  { %v177_v48 = vmul.f32 %v176_v46, %v155_v1 }
  0x6e   :  { %v213_v51 = vmul.f32 %v212_v49, %v187_v4 }
  0x6f   :  { %v178_v50 = vadd.f32 %v177_v48, %v175_v43 }
  0x70   :  { %v214_v52 = vadd.f32 %v213_v51, %v211_v47 }
  0x72   :  { %v215_v53 = vadd.f32 %v214_v52, %v178_v50 }
  0x74   :  { %234 = vst [vmem:[#allocation11 + $0x18] sm:$0xff] %v215_v53 }
  0x75   :  { %407 = shalt.err (!%p404_p2)
}
  0x76   :  { %s408_s16 = scalar_lea.hbm %s585_s6, 768 }
  0x77   :  { %p409_p3 = scmp.ne.s32.totalorder %s585_s6, %s408_s16  ;;  %p412_p4 = scmp.lt.u32.totalorder %s408_s16, %s585_s6 }
  0x79   :  { %p414_p5 = pnand %p412_p4, %p409_p3 }
  0x7b   :  { %417 = shalt.err (!%p414_p5)
}
  0x7c   :  { %254 = dma.vmem_to_hbm [thread:$0]  %s249_s12, 768, %s585_s6, [#allocation4], %s428_s9, %s428_s9, %s429_s10  }
  0x7d   :  { %424 = dma.done.wait [#allocation4], 768  }
  0x7e   :  { %425 = vsyncadd [#allocation4], 4294966528 }
  0x7f   :  { %258 = vsyncpa [#allocation3], 1 }
  0x80   :  { %259 = vsyncpa [#allocation6], 1 }
  0x81   :  { %260 = vsyncpa [#allocation9], 1 }
  0x82   :  { %261 = vsyncpa [#allocation4], 1 }

</bundles_post_ra>
